<compile_context>
chip_gen: v7x
topology: tpu7x:2x2x1
jax: 0.10.0
libtpu: 0.0.40
codegen_flags: <defaults>
</compile_context>

<pallas_src>
import functools

import jax
import jax.numpy as jnp
from jax import lax
from jax.experimental import pallas as pl
from jax.experimental.pallas import tpu as pltpu

LANE = 128
_TARGET_BLOCK_BYTES = 2 * 1024 * 1024          # ~2 MiB per input block per buffer
_SMALLEST_NORMAL = float(jnp.finfo(jnp.float32).tiny)


def _tensorcores_per_chip() -> int:
    """2 TensorCores on v4 / v5p / v7x, 1 on v5e / v6e. Conservative default: 1."""
    try:
        kind = jax.devices()[0].device_kind.lower()
    except Exception:
        return 1
    if any(tag in kind for tag in ("v4", "v5p", "v7", "7x")):
        return 2
    return 1


def _smape_kernel(x_ref, y_ref, out_ref, acc_ref, *,
                  rows_valid, block_rows, tiles_per_core, num_tiles,
                  any_ragged, reduce_to_8):
    c = pl.program_id(0)   # core / parallel axis
    i = pl.program_id(1)   # row-tile loop (reduction axis)

    @pl.when(i == 0)
    def _():
        acc_ref[...] = jnp.zeros_like(acc_ref)

    x = x_ref[...].astype(jnp.float32)
    y = y_ref[...].astype(jnp.float32)

    num = jnp.abs(y - x)
    denom = jnp.abs(y) + jnp.abs(x)
    # |y - x| <= |y| + |x|, so denom == 0 implies num == 0 and the clamped divide
    # returns exactly 0, matching torch _divide_no_nan for finite inputs.
    # TODO(synk): inputs containing Inf/NaN (or denominators overflowing to Inf)
    # are not zeroed here, unlike torch _divide_no_nan; acceptable per perf review.
    r = num / jnp.maximum(denom, jnp.float32(_SMALLEST_NORMAL))

    def accumulate(vals):
        if reduce_to_8:
            # Per-lane (8, 128) partial sums: single small accumulator RMW per step.
            acc_ref[...] += vals.reshape(block_rows // 8, 8, LANE).sum(axis=0)
        else:
            acc_ref[...] += vals

    if any_ragged:
        tile_idx = c * tiles_per_core + i   # unclamped global tile index

        @pl.when(tile_idx < num_tiles - 1)
        def _():                            # interior tiles: mask-free hot path
            accumulate(r)

        @pl.when(tile_idx >= num_tiles - 1)
        def _():                            # last tile / clamp-duplicated tiles
            row_ids = tile_idx * block_rows + lax.broadcasted_iota(
                jnp.int32, r.shape, 0)
            accumulate(jnp.where(row_ids < rows_valid, r, jnp.float32(0.0)))
    else:
        accumulate(r)

    @pl.when(i == pl.num_programs(1) - 1)
    def _():
        out_ref[0, 0] = jnp.sum(acc_ref[...])


def smape_loss(inpt, tgt, block_denom_grad: bool = True):
    """Forward-only sMAPE loss (darts SmapeLoss.forward)."""
    # TODO(synk): block_denom_grad only changes the backward pass (denominator
    # detach); the forward value is identical, so it is ignored here.
    assert inpt.shape == tgt.shape, "inpt and tgt must have the same shape"
    n_total = int(inpt.size)
    if n_total == 0:
        return jnp.float32(jnp.nan)   # mean over an empty tensor

    x = inpt.reshape(-1)   # keep original dtype; cast to f32 inside the kernel
    y = tgt.reshape(-1)

    n_main = (n_total // LANE) * LANE
    rows = n_main // LANE

    # Ragged tail (< 128 elements): done in plain JAX instead of padding the whole
    # flattened input (jnp.pad would cost a full extra HBM read+write per input).
    if n_main != n_total:
        xt = x[n_main:].astype(jnp.float32)
        yt = y[n_main:].astype(jnp.float32)
        num_t = jnp.abs(yt - xt)
        den_t = jnp.abs(yt) + jnp.abs(xt)
        tail = jnp.sum(num_t / jnp.maximum(den_t, jnp.float32(_SMALLEST_NORMAL)))
    else:
        tail = jnp.float32(0.0)

    if rows == 0:
        return tail / jnp.float32(n_total)

    x2 = (x if n_main == n_total else x[:n_main]).reshape(rows, LANE)
    y2 = (y if n_main == n_total else y[:n_main]).reshape(rows, LANE)

    # Block rows sized for ~2 MiB per input block (dtype-aware), multiple of 8.
    itemsize = jnp.dtype(inpt.dtype).itemsize
    max_rows = max(8, (_TARGET_BLOCK_BYTES // (LANE * itemsize)) // 8 * 8)
    block_rows = rows if rows <= max_rows else max_rows
    num_tiles = pl.cdiv(rows, block_rows)

    ncores = _tensorcores_per_chip()
    if num_tiles < 2:
        ncores = 1
    ncores = min(ncores, num_tiles)
    tiles_per_core = pl.cdiv(num_tiles, ncores)

    over_cover = ncores * tiles_per_core > num_tiles
    any_ragged = over_cover or (rows % block_rows != 0)
    reduce_to_8 = (block_rows % 8 == 0)
    acc_rows = 8 if reduce_to_8 else block_rows

    if over_cover:
        # Clamp so DMAs never target a fully out-of-bounds block; duplicated
        # (clamped) tiles are zeroed by the in-kernel row mask.
        def in_map(c, i):
            return (jnp.minimum(c * tiles_per_core + i, num_tiles - 1), 0)
    else:
        def in_map(c, i):
            return (c * tiles_per_core + i, 0)

    partials = pl.pallas_call(
        functools.partial(
            _smape_kernel,
            rows_valid=rows,
            block_rows=block_rows,
            tiles_per_core=tiles_per_core,
            num_tiles=num_tiles,
            any_ragged=any_ragged,
            reduce_to_8=reduce_to_8),
        out_shape=jax.ShapeDtypeStruct((ncores, 1), jnp.float32),
        grid=(ncores, tiles_per_core),
        in_specs=[
            pl.BlockSpec((block_rows, LANE), in_map),
            pl.BlockSpec((block_rows, LANE), in_map),
        ],
        out_specs=pl.BlockSpec((1, 1), lambda c, i: (c, 0),
                               memory_space=pltpu.SMEM),
        scratch_shapes=[pltpu.VMEM((acc_rows, LANE), jnp.float32)],
        compiler_params=pltpu.CompilerParams(
            dimension_semantics=("parallel", "arbitrary")),
    )(x2, y2)

    return (jnp.sum(partials) + tail) / jnp.float32(n_total)


if __name__ == "__main__":
    key = jax.random.PRNGKey(0)
    k1, k2, k3, k4 = jax.random.split(key, 4)

    def ref_smape(a, b):
        num = jnp.abs(b - a)
        denom = jnp.abs(b) + jnp.abs(a)
        ratio = jnp.where(denom != 0.0,
                          num / jnp.where(denom != 0.0, denom, 1.0), 0.0)
        return jnp.mean(ratio)

    # Small time-series-like shape: batch=2, seq=8, dims=32 (lane-aligned).
    shape = (2, 8, 32)
    inpt = jax.random.normal(k1, shape, dtype=jnp.float32)
    tgt = jax.random.normal(k2, shape, dtype=jnp.float32)
    # Include an exact 0/0 position to exercise the divide-no-nan path.
    inpt = inpt.at[0, 0, 0].set(0.0)
    tgt = tgt.at[0, 0, 0].set(0.0)

    loss = jax.block_until_ready(smape_loss(inpt, tgt))
    ref = ref_smape(inpt, tgt)
    assert jnp.allclose(loss, ref, rtol=1e-5, atol=1e-6), (loss, ref)

    # Misaligned shape (525 elems): 4 full 128-lane rows + 13-element ragged tail.
    shape2 = (3, 7, 25)
    inpt2 = jax.random.normal(k3, shape2, dtype=jnp.float32)
    tgt2 = jax.random.normal(k4, shape2, dtype=jnp.float32)
    loss2 = jax.block_until_ready(smape_loss(inpt2, tgt2))
    ref2 = ref_smape(inpt2, tgt2)
    assert jnp.allclose(loss2, ref2, rtol=1e-5, atol=1e-6), (loss2, ref2)

    print("KERNEL_OK")
</pallas_src>

<mosaic_0001>
module attributes {stable_mosaic.version = 11 : i64} {
  func.func @_smape_kernel(%arg0: i32, %arg1: i32, %arg2: memref<4x128xf32, #tpu.memory_space<vmem>>, %arg3: memref<4x128xf32, #tpu.memory_space<vmem>>, %arg4: memref<1x1xf32, #tpu.memory_space<smem>>, %arg5: memref<4x128xf32, #tpu.memory_space<vmem>>) attributes {dimension_semantics = [#tpu.dimension_semantics<parallel>, #tpu.dimension_semantics<arbitrary>], iteration_bounds = array<i64: 1, 1>, scalar_prefetch = 0 : i64, scratch_operands = 1 : i64, tpu.core_type = #tpu.core_type<tc>, window_params = [{transform_indices = @transform_0, window_bounds = array<i64: 4, 128>}, {transform_indices = @transform_1, window_bounds = array<i64: 4, 128>}, {transform_indices = @transform_2, window_bounds = array<i64: 1, 1>}]} {
    %c0_i32 = arith.constant 0 : i32
    %0 = arith.cmpi eq, %arg1, %c0_i32 : i32
    %1 = arith.extui %0 : i1 to i32
    %c0_i32_0 = arith.constant 0 : i32
    %2 = arith.cmpi ne, %1, %c0_i32_0 : i32
    scf.if %2 {
      %cst_10 = arith.constant 0.000000e+00 : f32
      %19 = vector.broadcast %cst_10 : f32 to vector<4x128xf32>
      %c0_11 = arith.constant 0 : index
      %c0_12 = arith.constant 0 : index
      %20 = vector.load %arg5[%c0_11, %c0_12] : memref<4x128xf32, #tpu.memory_space<vmem>>, vector<4x128xf32>
      tpu.vector_store %arg5[%c0_11, %c0_12], %19 {strides = array<i32>} : memref<4x128xf32, #tpu.memory_space<vmem>>, vector<4x128xf32>,
    } else {
    }
    %c0 = arith.constant 0 : index
    %c0_1 = arith.constant 0 : index
    %3 = vector.load %arg2[%c0, %c0_1] : memref<4x128xf32, #tpu.memory_space<vmem>>, vector<4x128xf32>
    %c0_2 = arith.constant 0 : index
    %c0_3 = arith.constant 0 : index
    %4 = vector.load %arg3[%c0_2, %c0_3] : memref<4x128xf32, #tpu.memory_space<vmem>>, vector<4x128xf32>
    %5 = arith.subf %4, %3 : vector<4x128xf32>
    %6 = math.absf %5 : vector<4x128xf32>
    %7 = math.absf %4 : vector<4x128xf32>
    %8 = math.absf %3 : vector<4x128xf32>
    %9 = arith.addf %7, %8 : vector<4x128xf32>
    %cst = arith.constant 1.17549435E-38 : f32
    %10 = vector.broadcast %cst : f32 to vector<4x128xf32>
    %11 = arith.maximumf %9, %10 : vector<4x128xf32>
    %12 = arith.divf %6, %11 : vector<4x128xf32>
    %c0_4 = arith.constant 0 : index
    %c0_5 = arith.constant 0 : index
    %13 = vector.load %arg5[%c0_4, %c0_5] : memref<4x128xf32, #tpu.memory_space<vmem>>, vector<4x128xf32>
    %14 = arith.addf %13, %12 : vector<4x128xf32>
    %c0_6 = arith.constant 0 : index
    %c0_7 = arith.constant 0 : index
    %15 = vector.load %arg5[%c0_6, %c0_7] : memref<4x128xf32, #tpu.memory_space<vmem>>, vector<4x128xf32>
    tpu.vector_store %arg5[%c0_6, %c0_7], %14 {strides = array<i32>} : memref<4x128xf32, #tpu.memory_space<vmem>>, vector<4x128xf32>,
    %c0_i32_8 = arith.constant 0 : i32
    %16 = arith.cmpi eq, %arg1, %c0_i32_8 : i32
    %17 = arith.extui %16 : i1 to i32
    %c0_i32_9 = arith.constant 0 : i32
    %18 = arith.cmpi ne, %17, %c0_i32_9 : i32
    scf.if %18 {
      %c0_10 = arith.constant 0 : index
      %c0_11 = arith.constant 0 : index
      %19 = vector.load %arg5[%c0_10, %c0_11] : memref<4x128xf32, #tpu.memory_space<vmem>>, vector<4x128xf32>
      %20 = vector.shape_cast %19 : vector<4x128xf32> to vector<1x4x128xf32>
      %cst_12 = arith.constant dense<0.000000e+00> : vector<1xf32>
      %21 = vector.multi_reduction <add>, %20, %cst_12 [1, 2] : vector<1x4x128xf32> to vector<1xf32>
      %22 = vector.shape_cast %21 : vector<1xf32> to vector<1x1x1xf32>
      %23 = vector.extract %22[0, 0, 0] : f32 from vector<1x1x1xf32>
      %c0_13 = arith.constant 0 : index
      %c0_14 = arith.constant 0 : index
      %24 = memref.load %arg4[%c0_13, %c0_14] : memref<1x1xf32, #tpu.memory_space<smem>>
      memref.store %23, %arg4[%c0_13, %c0_14] : memref<1x1xf32, #tpu.memory_space<smem>>
    } else {
    }
    return
  }
  func.func @transform_0(%arg0: i32, %arg1: i32) -> (i32, i32) {
    %c1_i32 = arith.constant 1 : i32
    %0 = arith.muli %arg0, %c1_i32 : i32
    %1 = arith.addi %0, %arg1 : i32
    %c0_i32 = arith.constant 0 : i32
    %c0_i32_0 = arith.constant 0 : i32
    return %1, %c0_i32 : i32, i32
  }
  func.func @transform_1(%arg0: i32, %arg1: i32) -> (i32, i32) {
    %c1_i32 = arith.constant 1 : i32
    %0 = arith.muli %arg0, %c1_i32 : i32
    %1 = arith.addi %0, %arg1 : i32
    %c0_i32 = arith.constant 0 : i32
    %c0_i32_0 = arith.constant 0 : i32
    return %1, %c0_i32 : i32, i32
  }
  func.func @transform_2(%arg0: i32, %arg1: i32) -> (i32, i32) {
    %c0_i32 = arith.constant 0 : i32
    %c0_i32_0 = arith.constant 0 : i32
    return %arg0, %c0_i32 : i32, i32
  }
}

</mosaic_0001>

<bundles_post_ra>
// kernel: tpu_custom_call.1
= control target key start
LH: loop header
LB: loop body
LE: loop exit
PB: predicated region body
PF: predicated region fallthrough
CT: control target
= control target key end

     0   :  { %7 = vsyncpa [#allocation4], 0  ;;  %s217_s0 = inlined_call_operand.hbm [shape: f32[4,128], index: 0, kind: input, shape index: {}]   ;;  %s218_s1 = inlined_call_operand.hbm [shape: f32[4,128], index: 1, kind: input, shape index: {}]   ;;  %s219_s2 = inlined_call_operand.hbm [shape: f32[1,1], index: 2, kind: output, shape index: {}]  }
   0x1   :  { %8 = vsyncpa [#allocation7], 0 }
   0x2   :  { %9 = vsyncpa [#allocation5], 0  ;;  %s162_s9 = smov [#allocation3]   ;;  %s163_s11 = smov [#allocation6]  }
   0x3   :  { %s19_s10 = sshll.u32 %s162_s9, 4  ;;  %s32_s12 = sshll.u32 %s163_s11, 4  ;;  %s20_s10 = int_to_ptr.vmem [resolvable:$true] %s19_s10  ;;  %s33_s12 = int_to_ptr.vmem [resolvable:$true] %s32_s12 }
   0x4   :  { %s102_s15 = scalar_lea.hbm %s217_s0, 64 }
   0x5   :  { %p103_p0 = scmp.ne.s32.totalorder %s217_s0, %s102_s15  ;;  %p106_p1 = scmp.lt.u32.totalorder %s102_s15, %s217_s0 }
   0x7   :  { %p108_p2 = pnand %p106_p1, %p103_p0 }
   0x9   :  { %111 = shalt.err (!%p108_p2)
}
   0xa   :  { %s112_s20 = scalar_lea.vmem %s20_s10, 64  ;;  %p117_p4 = scmp.lt.s32.totalorder %s20_s10, %s20_s10 }
   0xb   :  { %p113_p3 = scmp.ne.s32.totalorder %s20_s10, %s112_s20  ;;  %p118_p5 = scmp.lt.s32.totalorder %s112_s20, %s112_s20 }
   0xd   :  { %p119_p6 = por %p118_p5, %p117_p4 }
   0xf   :  { %p120_p7 = pnand %p119_p6, %p113_p3 }
  0x11   :  { %123 = shalt.err (!%p120_p7)
}
  0x12   :  { %22 = dma.hbm_to_vmem [thread:$0]  %s217_s0, 64, %s20_s10, [#allocation4]  }
  0x13   :  { %s124_s25 = scalar_lea.hbm %s218_s1, 64 }
  0x14   :  { %p125_p8 = scmp.ne.s32.totalorder %s218_s1, %s124_s25  ;;  %p128_p9 = scmp.lt.u32.totalorder %s124_s25, %s218_s1 }
  0x16   :  { %p130_p10 = pnand %p128_p9, %p125_p8 }
  0x18   :  { %133 = shalt.err (!%p130_p10)
}
  0x19   :  { %s134_s30 = scalar_lea.vmem %s33_s12, 64  ;;  %p139_p12 = scmp.lt.s32.totalorder %s33_s12, %s33_s12 }
  0x1a   :  { %p135_p11 = scmp.ne.s32.totalorder %s33_s12, %s134_s30  ;;  %p140_p13 = scmp.lt.s32.totalorder %s134_s30, %s134_s30 }
  0x1c   :  { %p141_p0 = por %p140_p13, %p139_p12 }
  0x1e   :  { %p142_p1 = pnand %p141_p0, %p135_p11 }
  0x20   :  { %145 = shalt.err (!%p142_p1)
}
  0x21   :  { %35 = dma.hbm_to_vmem [thread:$0]  %s218_s1, 64, %s33_s12, [#allocation7]  }
  0x22   :  { %156 = dma.done.wait [#allocation4], 64  }
  0x23   :  { %157 = vsyncadd [#allocation4], 4294967232 }
  0x24   :  { %158 = dma.done.wait [#allocation7], 64  }
  0x25   :  { %159 = vsyncadd [#allocation7], 4294967232  ;;  %v164_v0 = vmov 0.0   ;;  %v49_v1 = vld [vmem:[#allocation3] sm:$0xf]  ;;  %vm66_vm0 = vcmask 1043456  }
  0x26   :  { %48 = vst [vmem:[#allocation2] sm:$0xf] %v164_v0  ;;  %v50_v2 = vld [vmem:[#allocation6] sm:$0xf]  ;;  %v54_v4 = vand.u32 2147483647, %v49_v1 }
  0x27   :  { %v53_v3 = vand.u32 2147483647, %v50_v2  ;;  %v51_v7 = vsub.f32 %v50_v2, %v49_v1  ;;  %s146_s6 = scalar_lea.hbm %s219_s2, 16 }
  0x28   :  { %p147_p2 = scmp.ne.s32.totalorder %s219_s2, %s146_s6  ;;  %p150_p3 = scmp.lt.u32.totalorder %s146_s6, %s219_s2 }
  0x29   :  { %v55_v5 = vadd.f32 %v54_v4, %v53_v3  ;;  %v52_v8 = vand.u32 2147483647, %v51_v7 }
  0x2a   :  { %p152_p4 = pnand %p150_p3, %p147_p2 }
  0x2b   :  { %v56_v6 = vmax.f32 %v55_v5, 1.1754944e-38 }
  0x2d   :  { %100 = vrcp.f32 %v56_v6  ;;  %v59_v10 = vld [vmem:[#allocation2] sm:$0xf] }
  0x37   :  { %v101_v9 = vpop.eup %100 }
  0x38   :  { %v58_v11 = vmul.f32 %v101_v9, %v52_v8 }
  0x3a   :  { %v60_v12 = vadd.f32 %v59_v10, %v58_v11 }
  0x3c   :  { %61 = vst [vmem:[#allocation2] sm:$0xf] %v60_v12 }
  0x43   :  { %v65_v13 = vld [vmem:[#allocation2] sm:$0xf] }
  0x44   :  { %v67_v14 = vsel %vm66_vm0, %v65_v13, 0.0 }
  0x45   :  { %68 = vadd.xlane.f32.xlu0 %v67_v14 }
  0xd2   :  { %v69_v15 = vpop.xlane.xlu0 %68 }
  0xd3   :  { %v70_v16 = vrot.slane %v69_v15, 4 }
  0xd5   :  { %v71_v17 = vadd.f32 %v70_v16, %v69_v15 }
  0xd7   :  { %v72_v18 = vrot.slane %v71_v17, 2 }
  0xd9   :  { %v73_v19 = vadd.f32 %v72_v18, %v71_v17 }
  0xdb   :  { %v74_v20 = vrot.slane %v73_v19, 1 }
  0xdd   :  { %v75_v21 = vadd.f32 %v74_v20, %v73_v19 }
  0xdf   :  { %94 = vpush %v75_v21 }
 0x110   :  { %s95_s1 = spop %94 }
 0x111   :  { %78 = sst [smem:[#allocation8]] %s95_s1 }
 0x112   :  { %155 = shalt.err (!%p152_p4)
}
 0x113   :  { %s165_s11 = smov [#allocation8]  }
 0x114   :  { %86 = dma.smem_to_hbm %s165_s11, 16, %s219_s2, [#allocation5]  }
 0x115   :  { %160 = dma.done.wait [#allocation5], 16  }
 0x116   :  { %161 = vsyncadd [#allocation5], 4294967280 }
 0x117   :  { %90 = sfence }
 0x118   :  { %91 = vsyncpa [#allocation4], 1 }
 0x119   :  { %92 = vsyncpa [#allocation7], 1 }
 0x11a   :  { %93 = vsyncpa [#allocation5], 1 }

</bundles_post_ra>
